<compile_context>
chip_gen: v6e
topology: v6e:2x2x1
jax: 0.10.0
libtpu: 0.0.40
codegen_flags: <defaults>
</compile_context>

<pallas_src>
import functools

import jax
import jax.numpy as jnp
from jax import lax
from jax.experimental import pallas as pl
from jax.experimental.pallas import tpu as pltpu  # noqa: F401  (TPU-specific tuning hooks)

# ----------------------------- configuration -------------------------------
INPUT_FEATURES = 32
HIDDEN_DIMS = [64, 32]
OUTPUT_DIM = 1          # reduction-based final layer assumes OUTPUT_DIM == 1
USE_TANH = True
FINAL_MULT = 2.0
BN_EPS = 1e-5
N = 128                 # batch size (lives on the 128-lane axis inside the kernel)


# ------------------------------- kernel ------------------------------------
def mlp_kernel(x_ref,                # (N, F)        input, untransposed
               w1_ref,               # (H1, F)       BN0 + Linear1 + BN1 folded
               w2_ref,               # (H2, H1)      Linear2 + BN2 folded
               packed_ref,           # (H1+2*H2+1,1) [b1 | b2 | w3-col | b3] packed
               o_ref,                # (1, N)        lane-dense output row
               *, h1, h2, use_tanh, final_mult):
    # Static sublane slices into the packed small-operand column (all offsets are
    # multiples of 8, so these are cheap sublane selects).
    b1 = packed_ref[0:h1, :]                       # (H1, 1)
    b2 = packed_ref[h1:h1 + h2, :]                 # (H2, 1)
    w3 = packed_ref[h1 + h2:h1 + 2 * h2, :]        # (H2, 1)
    b3 = packed_ref[h1 + 2 * h2:h1 + 2 * h2 + 1, :]  # (1, 1)

    # Layer 1: contract over the feature axis of both operands -> (H1, N);
    # batch stays on the lane axis with no materialized transpose of x.
    h = lax.dot_general(w1_ref[...], x_ref[...],
                        dimension_numbers=(((1,), (1,)), ((), ())),
                        preferred_element_type=jnp.float32) + b1
    h = h * jax.nn.sigmoid(h)                      # SiLU (Dropout in eval = identity)

    # Layer 2: (H2, H1) @ (H1, N) -> (H2, N).
    h = jnp.dot(w2_ref[...], h, preferred_element_type=jnp.float32) + b2
    h = h * jax.nn.sigmoid(h)

    # Final Linear (output width 1): VPU multiply + sublane reduction, no MXU pass.
    y = jnp.sum(w3 * h, axis=0, keepdims=True) + b3   # (1, N)
    if use_tanh:
        y = jnp.tanh(y)
    o_ref[...] = (final_mult * y).astype(o_ref.dtype)


# --------------------- one-time parameter preparation -----------------------
def prepare_params(params):
    """Fold eval-mode BatchNorm affines + biases into the Linear weights.

    Called ONCE when parameters are loaded; the per-call forward only feeds the
    already-folded arrays to pallas_call (no per-call folding HLOs).
      BN1(W1 @ BN0(x) + b1) = (s1*W1*s0) @ x + (s1*(W1 @ t0 + b1) + t1)
      BN2(W2 @ h + b2)      = (s2*W2)    @ h + (s2*b2 + t2)
    """
    def fold_bn(gamma, beta, mean, var):
        scale = gamma / jnp.sqrt(var + BN_EPS)
        shift = beta - mean * scale
        return scale, shift

    s0, t0 = fold_bn(*params["bn0"])
    s1, t1 = fold_bn(*params["bn1"])
    s2, t2 = fold_bn(*params["bn2"])

    w1, b1 = params["w1"], params["b1"]     # (h1, f), (h1,)   PyTorch (out, in) layout
    w2, b2 = params["w2"], params["b2"]     # (h2, h1), (h2,)
    w3, b3 = params["w3"], params["b3"]     # (od, h2), (od,)

    w1e = (s1[:, None] * w1) * s0[None, :]
    b1e = s1 * (w1 @ t0 + b1) + t1
    w2e = s2[:, None] * w2
    b2e = s2 * b2 + t2

    # Pack all the small per-feature vectors into a single (H1+2*H2+1, 1) column
    # so the kernel takes 4 input DMAs instead of 7.
    packed = jnp.concatenate([b1e, b2e, w3.reshape(-1), b3]).reshape(-1, 1)
    return {"w1": w1e, "w2": w2e, "packed": packed}


# ------------------------------- forward ------------------------------------
@jax.jit
def mlp_forward(x, w1e, w2e, packed):
    n, f = x.shape
    h1, h2, od = HIDDEN_DIMS[0], HIDDEN_DIMS[1], OUTPUT_DIM
    assert od == 1, "reduction-based final layer assumes output_dim == 1"
    assert w1e.shape == (h1, f) and w2e.shape == (h2, h1)

    kernel = functools.partial(mlp_kernel, h1=h1, h2=h2,
                               use_tanh=USE_TANH, final_mult=FINAL_MULT)

    # No grid: every operand is a full-array VMEM block, single kernel invocation.
    yT = pl.pallas_call(
        kernel,
        out_shape=jax.ShapeDtypeStruct((od, n), x.dtype),
    )(x, w1e, w2e, packed)
    # (1, N) -> (N, 1): row-major layout no-op, so reshape (not transpose).
    return yT.reshape(n, od)


# --------------------------- reference (pure JAX) ---------------------------
def mlp_reference(x, params):
    def bn(h, gamma, beta, mean, var):
        return (h - mean) / jnp.sqrt(var + BN_EPS) * gamma + beta

    h = bn(x, *params["bn0"])
    h = h @ params["w1"].T + params["b1"]
    h = bn(h, *params["bn1"])
    h = h * jax.nn.sigmoid(h)
    h = h @ params["w2"].T + params["b2"]
    h = bn(h, *params["bn2"])
    h = h * jax.nn.sigmoid(h)
    y = h @ params["w3"].T + params["b3"]
    if USE_TANH:
        y = jnp.tanh(y)
    return FINAL_MULT * y


# ------------------------------ param init ----------------------------------
def init_params(key):
    f, h1, h2, od = INPUT_FEATURES, HIDDEN_DIMS[0], HIDDEN_DIMS[1], OUTPUT_DIM
    ks = jax.random.split(key, 18)

    def bn_params(kg, kb, km, kv, dim):
        gamma = 1.0 + 0.1 * jax.random.normal(kg, (dim,), jnp.float32)
        beta = 0.1 * jax.random.normal(kb, (dim,), jnp.float32)
        mean = 0.5 * jax.random.normal(km, (dim,), jnp.float32)
        var = jnp.abs(1.0 + 0.1 * jax.random.normal(kv, (dim,), jnp.float32))
        return gamma, beta, mean, var

    def linear(kw, kb, fan_in, fan_out):
        lim = 1.0 / jnp.sqrt(fan_in)
        w = jax.random.uniform(kw, (fan_out, fan_in), jnp.float32, -lim, lim)
        b = jax.random.uniform(kb, (fan_out,), jnp.float32, -lim, lim)
        return w, b

    w1, b1 = linear(ks[0], ks[1], f, h1)
    w2, b2 = linear(ks[2], ks[3], h1, h2)
    w3, b3 = linear(ks[4], ks[5], h2, od)
    return {
        "bn0": bn_params(ks[6], ks[7], ks[8], ks[9], f),
        "bn1": bn_params(ks[10], ks[11], ks[12], ks[13], h1),
        "bn2": bn_params(ks[14], ks[15], ks[16], ks[17], h2),
        "w1": w1, "b1": b1,
        "w2": w2, "b2": b2,
        "w3": w3, "b3": b3,
    }


if __name__ == "__main__":
    key = jax.random.PRNGKey(0)
    kx, kp = jax.random.split(key)
    x = jax.random.normal(kx, (N, INPUT_FEATURES), jnp.float32)
    params = init_params(kp)

    # BN folding / weight rescaling happens once, off the per-call path.
    folded = jax.tree_util.tree_map(jax.block_until_ready, prepare_params(params))

    out = mlp_forward(x, folded["w1"], folded["w2"], folded["packed"])
    out = jax.block_until_ready(out)

    ref = mlp_reference(x, params)
    assert out.shape == (N, OUTPUT_DIM)
    assert jnp.allclose(out, ref, atol=1e-4, rtol=1e-4), "mismatch vs JAX reference"
    # TODO(synk): training-mode Dropout masking / BatchNorm running-stat updates are
    # intentionally not implemented (eval-mode forward only).
    print("KERNEL_OK")
</pallas_src>

<mosaic_0001>
module attributes {stable_mosaic.version = 11 : i64} {
  func.func @mlp_kernel(%arg0: memref<128x32xf32, #tpu.memory_space<vmem>>, %arg1: memref<64x32xf32, #tpu.memory_space<vmem>>, %arg2: memref<32x64xf32, #tpu.memory_space<vmem>>, %arg3: memref<129x1xf32, #tpu.memory_space<vmem>>, %arg4: memref<1x128xf32, #tpu.memory_space<vmem>>) attributes {dimension_semantics = [], scalar_prefetch = 0 : i64, scratch_operands = 0 : i64, tpu.core_type = #tpu.core_type<tc>} {
    %c0 = arith.constant 0 : index
    %c0_0 = arith.constant 0 : index
    %0 = vector.load %arg3[%c0, %c0_0] : memref<129x1xf32, #tpu.memory_space<vmem>>, vector<64x1xf32>
    %c64 = arith.constant 64 : index
    %c0_1 = arith.constant 0 : index
    %1 = vector.load %arg3[%c64, %c0_1] : memref<129x1xf32, #tpu.memory_space<vmem>>, vector<32x1xf32>
    %c96 = arith.constant 96 : index
    %c0_2 = arith.constant 0 : index
    %2 = vector.load %arg3[%c96, %c0_2] : memref<129x1xf32, #tpu.memory_space<vmem>>, vector<32x1xf32>
    %c128 = arith.constant 128 : index
    %c0_3 = arith.constant 0 : index
    %3 = vector.load %arg3[%c128, %c0_3] : memref<129x1xf32, #tpu.memory_space<vmem>>, vector<1x1xf32>
    %c0_4 = arith.constant 0 : index
    %c0_5 = arith.constant 0 : index
    %4 = vector.load %arg1[%c0_4, %c0_5] : memref<64x32xf32, #tpu.memory_space<vmem>>, vector<64x32xf32>
    %c0_6 = arith.constant 0 : index
    %c0_7 = arith.constant 0 : index
    %5 = vector.load %arg0[%c0_6, %c0_7] : memref<128x32xf32, #tpu.memory_space<vmem>>, vector<128x32xf32>
    %cst = arith.constant dense<0.000000e+00> : vector<64x128xf32>
    %6 = tpu.matmul %4, %5, %cst {dimension_numbers = #tpu.dot_dimension_numbers<[1], [1], [0], [0], [0, 0, 1, 0], [], []>} : vector<64x32xf32>, vector<128x32xf32>, vector<64x128xf32> -> vector<64x128xf32>
    %7 = vector.broadcast %0 : vector<64x1xf32> to vector<64x128xf32>
    %8 = arith.addf %6, %7 : vector<64x128xf32>
    %9 = arith.negf %8 : vector<64x128xf32>
    %10 = math.exp %9 : vector<64x128xf32>
    %cst_8 = arith.constant 1.000000e+00 : f32
    %11 = vector.broadcast %cst_8 : f32 to vector<64x128xf32>
    %12 = arith.addf %11, %10 : vector<64x128xf32>
    %13 = arith.divf %11, %12 : vector<64x128xf32>
    %14 = arith.mulf %8, %13 : vector<64x128xf32>
    %c0_9 = arith.constant 0 : index
    %c0_10 = arith.constant 0 : index
    %15 = vector.load %arg2[%c0_9, %c0_10] : memref<32x64xf32, #tpu.memory_space<vmem>>, vector<32x64xf32>
    %cst_11 = arith.constant dense<0.000000e+00> : vector<32x128xf32>
    %16 = tpu.matmul %15, %14, %cst_11 {dimension_numbers = #tpu.dot_dimension_numbers<[1], [0], [0], [1], [0, 0, 1, 1], [], []>} : vector<32x64xf32>, vector<64x128xf32>, vector<32x128xf32> -> vector<32x128xf32>
    %17 = vector.broadcast %1 : vector<32x1xf32> to vector<32x128xf32>
    %18 = arith.addf %16, %17 : vector<32x128xf32>
    %19 = arith.negf %18 : vector<32x128xf32>
    %20 = math.exp %19 : vector<32x128xf32>
    %cst_12 = arith.constant 1.000000e+00 : f32
    %21 = vector.broadcast %cst_12 : f32 to vector<32x128xf32>
    %22 = arith.addf %21, %20 : vector<32x128xf32>
    %23 = arith.divf %21, %22 : vector<32x128xf32>
    %24 = arith.mulf %18, %23 : vector<32x128xf32>
    %25 = vector.broadcast %2 : vector<32x1xf32> to vector<32x128xf32>
    %26 = arith.mulf %25, %24 : vector<32x128xf32>
    %cst_13 = arith.constant dense<0.000000e+00> : vector<128xf32>
    %27 = vector.multi_reduction <add>, %26, %cst_13 [0] : vector<32x128xf32> to vector<128xf32>
    %28 = vector.shape_cast %27 : vector<128xf32> to vector<1x128xf32>
    %29 = vector.broadcast %3 : vector<1x1xf32> to vector<1x128xf32>
    %30 = arith.addf %28, %29 : vector<1x128xf32>
    %31 = math.tanh %30 : vector<1x128xf32>
    %cst_14 = arith.constant 2.000000e+00 : f32
    %32 = vector.broadcast %cst_14 : f32 to vector<1x128xf32>
    %33 = arith.mulf %32, %31 : vector<1x128xf32>
    %c0_15 = arith.constant 0 : index
    %c0_16 = arith.constant 0 : index
    %34 = vector.load %arg4[%c0_15, %c0_16] : memref<1x128xf32, #tpu.memory_space<vmem>>, vector<1x128xf32>
    tpu.vector_store %arg4[%c0_15, %c0_16], %33 {strides = array<i32>} : memref<1x128xf32, #tpu.memory_space<vmem>>, vector<1x128xf32>,
    return
  }
}

</mosaic_0001>

<bundles_post_ra>
// kernel: mlp_forward.1
= control target key start
LH: loop header
LB: loop body
LE: loop exit
PB: predicated region body
PF: predicated region fallthrough
CT: control target
= control target key end

     0   :  { %vm99_vm0 = vcmask 261120   ;;  %v757_v2 = vmov 0   ;;  %s978_s0 = inlined_call_operand.vmem [shape: f32[128,32], index: 0, kind: input, shape index: {}]   ;;  %s979_s1 = inlined_call_operand.vmem [shape: f32[64,32], index: 1, kind: input, shape index: {}]   ;;  %s980_s2 = inlined_call_operand.vmem [shape: f32[32,64], index: 2, kind: input, shape index: {}]   ;;  %s981_s3 = inlined_call_operand.vmem [shape: f32[129,1], index: 3, kind: input, shape index: {}]   ;;  %s982_s4 = inlined_call_operand.hbm [shape: f32[1,128], index: 4, kind: output, shape index: {}]  }
   0x1   :  { %v58_v0 = vld [vmem:[%s978_s0 + $0x78] sm:$0xff]  ;;  %v57_v1 = vld [vmem:[%s978_s0 + $0x70] sm:$0xff]  ;;  %683 = vset.pattern.permute.xlu0 %v757_v2  ;;  %684 = vset.pattern.permute.xlu1 %v757_v2  ;;  %v56_v3 = vld [vmem:[%s978_s0 + $0x68] sm:$0xff] }
   0x2   :  { %615 = vmatprep.subr.msk.mxu0 %vm99_vm0, %v58_v0  ;;  %v35_v4 = vld [vmem:[%s979_s1] sm:$0xff]  ;;  %v25_v6 = vld [vmem:[%s981_s3 + $0x38] sm:$0xff]  ;;  %v23_v7 = vld [vmem:[%s981_s3 + $0x28] sm:$0xff] }
   0x3   :  { %616 = vmatpush3.xpose.msk.msra.mxu0 %vm99_vm0, %v58_v0  ;;  %647 = vmatprep.mubr.msk.f32.mxu0 %vm99_vm0, %v35_v4  ;;  %v55_v5 = vld [vmem:[%s978_s0 + $0x60] sm:$0xff]  ;;  %v24_v8 = vld [vmem:[%s981_s3 + $0x30] sm:$0xff]  ;;  %v54_v10 = vld [vmem:[%s978_s0 + $0x58] sm:$0xff] }
   0x4   :  { %617 = vmatprep.subr.msk.mxu0 %vm99_vm0, %v57_v1  ;;  %96 = vperm.xlu0 %683, %v25_v6   ;;  %v22_v9 = vld [vmem:[%s981_s3 + $0x20] sm:$0xff] }
   0x5   :  { %86 = vperm.xlu1 %684, %v23_v7  }
   0x7   :  { %618 = vmatpush3.xpose.msk.msra.mxu0 %vm99_vm0, %v57_v1 }
   0x8   :  { %619 = vmatprep.subr.msk.mxu0 %vm99_vm0, %v56_v3  ;;  %91 = vperm.xlu0 %683, %v24_v8  }
   0x9   :  { %81 = vperm.xlu1 %684, %v22_v9  }
   0xb   :  { %620 = vmatpush3.xpose.msk.msra.mxu0 %vm99_vm0, %v56_v3 }
   0xc   :  { %621 = vmatprep.subr.msk.mxu0 %vm99_vm0, %v55_v5 }
   0xd   :  { %9 = vsyncpa [#allocation3], 0  ;;  %v21_v11 = vld [vmem:[%s981_s3 + $0x18] sm:$0xff]  ;;  %v20_v12 = vld [vmem:[%s981_s3 + $0x10] sm:$0xff]  ;;  %vm357_vm1 = vcmask 523264  }
   0xe   :  { %v53_v13 = vld [vmem:[%s978_s0 + $0x50] sm:$0xff]  ;;  %76 = vperm.xlu0 %683, %v21_v11   ;;  %71 = vperm.xlu1 %684, %v20_v12   ;;  %v19_v14 = vld [vmem:[%s981_s3 + $0x8] sm:$0xff]  ;;  %v18_v15 = vld [vmem:[%s981_s3] sm:$0xff] }
   0xf   :  { %622 = vmatpush3.xpose.msk.msra.mxu0 %vm99_vm0, %v55_v5  ;;  %v52_v16 = vld [vmem:[%s978_s0 + $0x48] sm:$0xff]  ;;  %v26_v17 = vld [vmem:[%s981_s3 + $0x40] sm:$0xff]  ;;  %v28_v20 = vld [vmem:[%s981_s3 + $0x50] sm:$0xff] }
  0x10   :  { %623 = vmatprep.subr.msk.mxu0 %vm99_vm0, %v54_v10  ;;  %v27_v18 = vld [vmem:[%s981_s3 + $0x48] sm:$0xff]  ;;  %v51_v19 = vld [vmem:[%s978_s0 + $0x40] sm:$0xff]  ;;  %v29_v21 = vld [vmem:[%s981_s3 + $0x58] sm:$0xff] }
  0x11   :  { %v50_v22 = vld [vmem:[%s978_s0 + $0x38] sm:$0xff]  ;;  %v30_v23 = vld [vmem:[%s981_s3 + $0x60] sm:$0xff]  ;;  %v31_v24 = vld [vmem:[%s981_s3 + $0x68] sm:$0xff] }
  0x12   :  { %66 = vperm.xlu0 %683, %v19_v14   ;;  %61 = vperm.xlu1 %684, %v18_v15   ;;  %v49_v25 = vld [vmem:[%s978_s0 + $0x30] sm:$0xff]  ;;  %v33_v27 = vld [vmem:[%s981_s3 + $0x78] sm:$0xff]  ;;  %v48_v28 = vld [vmem:[%s978_s0 + $0x28] sm:$0xff] }
  0x13   :  { %624 = vmatpush3.xpose.msk.msra.mxu0 %vm99_vm0, %v54_v10  ;;  %v32_v26 = vld [vmem:[%s981_s3 + $0x70] sm:$0xff]  ;;  %v34_v29 = vld [vmem:[%s981_s3 + $0x80] sm:$0x1]  ;;  %v46_v31 = vld [vmem:[%s978_s0 + $0x18] sm:$0xff] }
  0x14   :  { %625 = vmatprep.subr.msk.mxu0 %vm99_vm0, %v53_v13  ;;  %v47_v30 = vld [vmem:[%s978_s0 + $0x20] sm:$0xff]  ;;  %v45_v32 = vld [vmem:[%s978_s0 + $0x10] sm:$0xff]  ;;  %v44_v33 = vld [vmem:[%s978_s0 + $0x8] sm:$0xff] }
  0x15   :  { %v43_v34 = vld [vmem:[%s978_s0] sm:$0xff]  ;;  %v36_v35 = vld [vmem:[%s979_s1 + $0x8] sm:$0xff]  ;;  %v37_v36 = vld [vmem:[%s979_s1 + $0x10] sm:$0xff] }
  0x16   :  { %339 = vperm.xlu0 %683, %v26_v17   ;;  %344 = vperm.xlu1 %684, %v27_v18   ;;  %v38_v37 = vld [vmem:[%s979_s1 + $0x18] sm:$0xff]  ;;  %v39_v38 = vld [vmem:[%s979_s1 + $0x20] sm:$0xff]  ;;  %v40_v39 = vld [vmem:[%s979_s1 + $0x28] sm:$0xff] }
  0x17   :  { %626 = vmatpush3.xpose.msk.msra.mxu0 %vm99_vm0, %v53_v13  ;;  %v41_v40 = vld [vmem:[%s979_s1 + $0x30] sm:$0xff]  ;;  %v42_v41 = vld [vmem:[%s979_s1 + $0x38] sm:$0xff]  ;;  %v333_v42 = vld [vmem:[%s980_s2] sm:$0xff] }
  0x18   :  { %627 = vmatprep.subr.msk.mxu0 %vm99_vm0, %v52_v16  ;;  %675 = vmatprep.mubr.msk.f32.mxu1 %vm357_vm1, %v333_v42 }
  0x1a   :  { %349 = vperm.xlu0 %683, %v28_v20   ;;  %354 = vperm.xlu1 %684, %v29_v21  }
  0x1b   :  { %628 = vmatpush3.xpose.msk.msra.mxu0 %vm99_vm0, %v52_v16 }
  0x1c   :  { %629 = vmatprep.subr.msk.mxu0 %vm99_vm0, %v51_v19 }
  0x1e   :  { %485 = vperm.xlu0 %683, %v30_v23   ;;  %490 = vperm.xlu1 %684, %v31_v24  }
  0x1f   :  { %630 = vmatpush3.xpose.msk.msra.mxu0 %vm99_vm0, %v51_v19 }
  0x20   :  { %631 = vmatprep.subr.msk.mxu0 %vm99_vm0, %v50_v22 }
  0x22   :  { %495 = vperm.xlu0 %683, %v32_v26   ;;  %500 = vperm.xlu1 %684, %v33_v27  }
  0x23   :  { %632 = vmatpush3.xpose.msk.msra.mxu0 %vm99_vm0, %v50_v22 }
  0x24   :  { %633 = vmatprep.subr.msk.mxu0 %vm99_vm0, %v49_v25 }
  0x26   :  { %518 = vperm.xlu0 %683, %v34_v29  }
  0x27   :  { %634 = vmatpush3.xpose.msk.msra.mxu0 %vm99_vm0, %v49_v25 }
  0x28   :  { %635 = vmatprep.subr.msk.mxu0 %vm99_vm0, %v48_v28 }
  0x2b   :  { %636 = vmatpush3.xpose.msk.msra.mxu0 %vm99_vm0, %v48_v28 }
  0x2c   :  { %637 = vmatprep.subr.msk.mxu0 %vm99_vm0, %v47_v30 }
  0x2f   :  { %638 = vmatpush3.xpose.msk.msra.mxu0 %vm99_vm0, %v47_v30 }
  0x30   :  { %639 = vmatprep.subr.msk.mxu0 %vm99_vm0, %v46_v31 }
  0x33   :  { %640 = vmatpush3.xpose.msk.msra.mxu0 %vm99_vm0, %v46_v31 }
  0x34   :  { %641 = vmatprep.subr.msk.mxu0 %vm99_vm0, %v45_v32 }
  0x37   :  { %642 = vmatpush3.xpose.msk.msra.mxu0 %vm99_vm0, %v45_v32 }
  0x38   :  { %643 = vmatprep.subr.msk.mxu0 %vm99_vm0, %v44_v33 }
  0x3b   :  { %644 = vmatpush3.xpose.msk.msra.mxu0 %vm99_vm0, %v44_v33 }
  0x3c   :  { %645 = vmatprep.subr.msk.mxu0 %vm99_vm0, %v43_v34 }
  0x3f   :  { %646 = vmatpush3.xpose.msk.msra.mxu0 %vm99_vm0, %v43_v34 }
  0x42   :  { %648 = vmatmul.mubr.msk.f32.vlgmr.msra.gmra.mxu0 %vm99_vm0, %v36_v35 }
  0x43   :  { %650 = vmatprep.mubr.msk.f32.mxu0 %vm99_vm0, %v37_v36 }
  0x46   :  { %651 = vmatmul.mubr.msk.f32.gmra.mxu0 %vm99_vm0, %v38_v37 }
  0x47   :  { %653 = vmatprep.mubr.msk.f32.mxu0 %vm99_vm0, %v39_v38 }
  0x4a   :  { %654 = vmatmul.mubr.msk.f32.gmra.mxu0 %vm99_vm0, %v40_v39 }
  0x4b   :  { %656 = vmatprep.mubr.msk.f32.mxu0 %vm99_vm0, %v41_v40 }
  0x4e   :  { %657 = vmatmul.mubr.msk.f32.gmra.mxu0 %vm99_vm0, %v42_v41 }
  0x7f   :  { %v97_v43 = vpop.permute.xlu0 %96 }
  0x80   :  { %v87_v44 = vpop.permute.xlu1 %86 }
  0x83   :  { %v92_v46 = vpop.permute.xlu0 %91 }
  0x84   :  { %v82_v48 = vpop.permute.xlu1 %81 }
  0x89   :  { %v77_v51 = vpop.permute.xlu0 %76  ;;  %v72_v54 = vpop.permute.xlu1 %71 }
  0x8d   :  { %v67_v63 = vpop.permute.xlu0 %66  ;;  %v62_v5 = vpop.permute.xlu1 %61 }
 0x102   :  { %v649_v45 = vpop.f32.mrf.mxu0 }
 0x103   :  { %v956_v2 = vadd.f32 %v649_v45, %v67_v63  ;;  %v336_v45 = vld [vmem:[%s980_s2 + $0x18] sm:$0xff] }
 0x104   :  { %v238_v47 = vpop.f32.mrf.mxu0 }
 0x105   :  { %v239_v6 = vadd.f32 %v238_v47, %v62_v5  ;;  %v564_v9 = vmul.f32 -1.442695, %v956_v2  ;;  %v340_v47 = vpop.permute.xlu0 %339 }
 0x106   :  { %v652_v49 = vpop.f32.mrf.mxu0 }
 0x107   :  { %v951_v55 = vadd.f32 %v652_v49, %v77_v51  ;;  %v563_v10 = vmul.f32 -1.442695, %v239_v6 }
 0x108   :  { %v248_v50 = vpop.f32.mrf.mxu0 }
 0x109   :  { %v953_v60 = vadd.f32 %v248_v50, %v72_v54  ;;  %v566_v0 = vmul.f32 -1.442695, %v951_v55 }
 0x10a   :  { %v655_v52 = vpop.f32.mrf.mxu0 }
 0x10b   :  { %v264_v53 = vadd.f32 %v655_v52, %v87_v44  ;;  %v565_v7 = vmul.f32 -1.442695, %v953_v60  ;;  %v335_v44 = vld [vmem:[%s980_s2 + $0x10] sm:$0xff] }
 0x10c   :  { %v258_v56 = vpop.f32.mrf.mxu0 }
 0x10d   :  { %v568_v57 = vmul.f32 -1.442695, %v264_v53  ;;  %v259_v58 = vadd.f32 %v258_v56, %v82_v48 }
 0x10e   :  { %v658_v59 = vpop.f32.mrf.mxu0 }
 0x10f   :  { %v567_v61 = vmul.f32 -1.442695, %v259_v58  ;;  %v274_v62 = vadd.f32 %v658_v59, %v97_v43  ;;  %685 = vpow2.f32 %v568_v57  ;;  %v334_v43 = vld [vmem:[%s980_s2 + $0x8] sm:$0xff]  ;;  %v350_v57 = vpop.permute.xlu0 %349  ;;  %s758_s2 = smov [#allocation2]  }
 0x110   :  { %v268_v1 = vpop.f32.mrf.mxu0  ;;  %s531_s24 = sshll.u32 %s758_s2, 4  ;;  %s532_s24 = int_to_ptr.vmem [resolvable:$true] %s531_s24 }
 0x111   :  { %v570_v3 = vmul.f32 -1.442695, %v274_v62  ;;  %v269_v4 = vadd.f32 %v268_v1, %v92_v46  ;;  %687 = vpow2.f32 %v567_v61  ;;  %v345_v46 = vpop.permute.xlu1 %344  ;;  %s735_s3 = scalar_lea.vmem %s532_s24, 16  ;;  %s739_s25 = scalar_lea.vmem %s532_s24, 32 }
 0x112   :  { %p736_p0 = scmp.ne.s32.totalorder %s532_s24, %s735_s3  ;;  %p740_p1 = scmp.lt.s32.totalorder %s532_s24, %s532_s24 }
 0x113   :  { %689 = vpow2.f32 %v570_v3  ;;  %v569_v8 = vmul.f32 -1.442695, %v269_v4  ;;  %p741_p2 = scmp.lt.s32.totalorder %s739_s25, %s735_s3 }
 0x114   :  { %691 = vpow2.f32 %v566_v0 }
 0x115   :  { %693 = vpow2.f32 %v569_v8  ;;  %v486_v8 = vpop.permute.xlu0 %485  ;;  %p742_p3 = por %p741_p2, %p740_p1 }
 0x116   :  { %695 = vpow2.f32 %v565_v7 }
 0x117   :  { %697 = vpow2.f32 %v564_v9  ;;  %p743_p4 = pnand %p742_p3, %p736_p0 }
 0x118   :  { %699 = vpow2.f32 %v563_v10 }
 0x11c   :  { %v686_v11 = vpop.eup %685 }
 0x11d   :  { %v306_v14 = vadd.f32 1.0, %v686_v11 }
 0x11e   :  { %v688_v12 = vpop.eup %687 }
 0x11f   :  { %v305_v18 = vadd.f32 1.0, %v688_v12 }
 0x120   :  { %v690_v13 = vpop.eup %689 }
 0x121   :  { %v692_v15 = vpop.eup %691  ;;  %v308_v16 = vadd.f32 1.0, %v690_v13 }
 0x122   :  { %v694_v17 = vpop.eup %693  ;;  %v304_v21 = vadd.f32 1.0, %v692_v15 }
 0x123   :  { %701 = vrcp.f32 %v308_v16  ;;  %v307_v19 = vadd.f32 1.0, %v694_v17  ;;  %v696_v20 = vpop.eup %695 }
 0x124   :  { %703 = vrcp.f32 %v306_v14  ;;  %v698_v22 = vpop.eup %697  ;;  %v303_v23 = vadd.f32 1.0, %v696_v20 }
 0x125   :  { %705 = vrcp.f32 %v307_v19  ;;  %v700_v24 = vpop.eup %699  ;;  %v302_v25 = vadd.f32 1.0, %v698_v22 }
 0x126   :  { %707 = vrcp.f32 %v305_v18  ;;  %v301_v26 = vadd.f32 1.0, %v700_v24  ;;  %v496_v18 = vpop.permute.xlu0 %495 }
 0x127   :  { %709 = vrcp.f32 %v304_v21 }
 0x128   :  { %711 = vrcp.f32 %v303_v23 }
 0x129   :  { %713 = vrcp.f32 %v302_v25 }
 0x12a   :  { %715 = vrcp.f32 %v301_v26 }
 0x130   :  { %v702_v27 = vpop.eup %701 }
 0x131   :  { %v704_v28 = vpop.eup %703  ;;  %v332_v29 = vmul.f32 %v702_v27, %v274_v62 }
 0x132   :  { %v706_v30 = vpop.eup %705  ;;  %v330_v33 = vmul.f32 %v704_v28, %v264_v53  ;;  %v355_v53 = vpop.permute.xlu1 %354 }
 0x133   :  { %v331_v31 = vmul.f32 %v706_v30, %v269_v4  ;;  %659 = vmatprep.subr.mxu1 %v332_v29  ;;  %v708_v32 = vpop.eup %707 }
 0x134   :  { %660 = vmatpush3.msra.mxu1 %v332_v29  ;;  %v710_v34 = vpop.eup %709  ;;  %v329_v35 = vmul.f32 %v708_v32, %v259_v58 }
 0x135   :  { %661 = vmatprep.subr.mxu1 %v331_v31  ;;  %v712_v36 = vpop.eup %711  ;;  %v328_v37 = vmul.f32 %v710_v34, %v951_v55 }
 0x136   :  { %662 = vmatpush3.msra.mxu1 %v331_v31  ;;  %v714_v38 = vpop.eup %713  ;;  %v327_v39 = vmul.f32 %v712_v36, %v953_v60  ;;  %v491_v12 = vpop.permute.xlu1 %490 }
 0x137   :  { %663 = vmatprep.subr.mxu1 %v330_v33  ;;  %v716_v40 = vpop.eup %715  ;;  %v326_v41 = vmul.f32 %v714_v38, %v956_v2  ;;  %v519_v31 = vpop.permute.xlu0 %518 }
 0x138   :  { %664 = vmatpush3.msra.mxu1 %v330_v33  ;;  %v325_v42 = vmul.f32 %v716_v40, %v239_v6 }
 0x139   :  { %665 = vmatprep.subr.mxu1 %v329_v35 }
 0x13a   :  { %666 = vmatpush3.msra.mxu1 %v329_v35  ;;  %v501_v21 = vpop.permute.xlu1 %500 }
 0x13b   :  { %667 = vmatprep.subr.mxu1 %v328_v37 }
 0x13c   :  { %668 = vmatpush3.msra.mxu1 %v328_v37 }
 0x13d   :  { %669 = vmatprep.subr.mxu1 %v327_v39 }
 0x13e   :  { %670 = vmatpush3.msra.mxu1 %v327_v39 }
 0x13f   :  { %671 = vmatprep.subr.mxu1 %v326_v41 }
 0x140   :  { %672 = vmatpush3.msra.mxu1 %v326_v41 }
 0x141   :  { %673 = vmatprep.subr.mxu1 %v325_v42 }
 0x142   :  { %674 = vmatpush3.msra.mxu1 %v325_v42 }
 0x143   :  { %676 = vmatmul.mubr.msk.f32.vlgmr.msra.gmra.mxu1 %vm357_vm1, %v334_v43 }
 0x144   :  { %678 = vmatprep.mubr.msk.f32.mxu1 %vm357_vm1, %v335_v44 }
 0x147   :  { %679 = vmatmul.mubr.msk.f32.gmra.mxu1 %vm357_vm1, %v336_v45 }
 0x203   :  { %v677_v48 = vpop.f32.mrf.mxu1 }
 0x204   :  { %v442_v49 = vadd.f32 %v677_v48, %v345_v46 }
 0x205   :  { %v436_v50 = vpop.f32.mrf.mxu1 }
 0x206   :  { %v576_v51 = vmul.f32 -1.442695, %v442_v49  ;;  %v437_v52 = vadd.f32 %v436_v50, %v340_v47 }
 0x207   :  { %v680_v54 = vpop.f32.mrf.mxu1 }
 0x208   :  { %717 = vpow2.f32 %v576_v51  ;;  %v575_v55 = vmul.f32 -1.442695, %v437_v52  ;;  %v452_v56 = vadd.f32 %v680_v54, %v355_v53 }
 0x209   :  { %v446_v58 = vpop.f32.mrf.mxu1 }
 0x20a   :  { %719 = vpow2.f32 %v575_v55  ;;  %v578_v59 = vmul.f32 -1.442695, %v452_v56  ;;  %v447_v60 = vadd.f32 %v446_v58, %v350_v57 }
 0x20c   :  { %721 = vpow2.f32 %v578_v59  ;;  %v577_v61 = vmul.f32 -1.442695, %v447_v60 }
 0x20e   :  { %723 = vpow2.f32 %v577_v61 }
 0x215   :  { %v718_v62 = vpop.eup %717 }
 0x216   :  { %v468_v63 = vadd.f32 1.0, %v718_v62 }
 0x217   :  { %v720_v0 = vpop.eup %719 }
 0x218   :  { %725 = vrcp.f32 %v468_v63  ;;  %v467_v1 = vadd.f32 1.0, %v720_v0 }
 0x219   :  { %v722_v2 = vpop.eup %721 }
 0x21a   :  { %727 = vrcp.f32 %v467_v1  ;;  %v470_v3 = vadd.f32 1.0, %v722_v2 }
 0x21b   :  { %v724_v4 = vpop.eup %723 }
 0x21c   :  { %729 = vrcp.f32 %v470_v3  ;;  %v469_v5 = vadd.f32 1.0, %v724_v4 }
 0x21e   :  { %731 = vrcp.f32 %v469_v5 }
 0x225   :  { %v726_v6 = vpop.eup %725 }
 0x226   :  { %v480_v9 = vmul.f32 %v726_v6, %v442_v49 }
 0x227   :  { %v728_v7 = vpop.eup %727 }
 0x228   :  { %v479_v10 = vmul.f32 %v728_v7, %v437_v52  ;;  %v504_v15 = vmul.f32 %v491_v12, %v480_v9 }
 0x229   :  { %v730_v11 = vpop.eup %729 }
 0x22a   :  { %v503_v13 = vmul.f32 %v486_v8, %v479_v10  ;;  %v482_v16 = vmul.f32 %v730_v11, %v452_v56 }
 0x22b   :  { %v732_v14 = vpop.eup %731 }
 0x22c   :  { %v481_v17 = vmul.f32 %v732_v14, %v447_v60  ;;  %v507_v19 = vadd.f32 %v504_v15, %v503_v13  ;;  %v506_v22 = vmul.f32 %v501_v21, %v482_v16 }
 0x22e   :  { %v505_v20 = vmul.f32 %v496_v18, %v481_v17 }
 0x230   :  { %v508_v23 = vadd.f32 %v507_v19, %v505_v20 }
 0x232   :  { %v509_v24 = vadd.f32 %v508_v23, %v506_v22 }
 0x234   :  { %v510_v25 = vrot.slane %v509_v24, 4 }
 0x236   :  { %v511_v26 = vadd.f32 %v510_v25, %v509_v24 }
 0x238   :  { %v512_v27 = vrot.slane %v511_v26, 2 }
 0x23a   :  { %v513_v28 = vadd.f32 %v512_v27, %v511_v26 }
 0x23c   :  { %v514_v29 = vrot.slane %v513_v28, 1 }
 0x23e   :  { %v515_v30 = vadd.f32 %v514_v29, %v513_v28 }
 0x240   :  { %v521_v32 = vadd.f32 %v519_v31, %v515_v30 }
 0x242   :  { %733 = vtanh.f32 %v521_v32 }
 0x24f   :  { %v734_v33 = vpop.eup %733 }
 0x250   :  { %v523_v34 = vmul.f32 2.0, %v734_v33 }
 0x252   :  { %524 = vst [vmem:[#allocation2] sm:$0x1] %v523_v34 }
 0x253   :  { %746 = shalt.err (!%p743_p4)
}
 0x254   :  { %534 = dma.vmem_to_hbm [thread:$0]  %s532_s24, 16, %s982_s4, [#allocation3]  }
 0x255   :  { %755 = dma.done.wait [#allocation3], 16  }
 0x256   :  { %756 = vsyncadd [#allocation3], 4294967280 }
 0x257   :  { %538 = vsyncpa [#allocation3], 1 }

</bundles_post_ra>
